<compile_context>
chip_gen: v7x
topology: tpu7x:2x2x1
jax: 0.10.0
libtpu: 0.0.40
codegen_flags: <defaults>
</compile_context>

<pallas_src>
import functools

import jax
import jax.numpy as jnp
from jax.experimental import pallas as pl
from jax.experimental.pallas import tpu as pltpu


def _focal_cosine_kernel(x_ref, t_ref, out_ref, *, n_rows):
    i = pl.program_id(0)

    x = x_ref[...].astype(jnp.float32)            # (TN, C)
    t = t_ref[...]                                # (TN, 1) int32
    tn, c = x.shape

    # x[i, target[i]] via masked row-reduction (no materialized f32 one-hot).
    col = jax.lax.broadcasted_iota(jnp.int32, (tn, c), 1)
    x_t = jnp.sum(jnp.where(col == t, x, 0.0), axis=-1, keepdims=True)   # (TN, 1)

    # Per-row norm denominators. torch uses eps=1e-8 for the cosine denominator
    # and eps=1e-12 for F.normalize; 1/max(||x||, eps) == rsqrt(max(||x||^2, eps^2)).
    sumsq = jnp.sum(x * x, axis=-1, keepdims=True)                       # (TN, 1)
    inv8 = jax.lax.rsqrt(jnp.maximum(sumsq, 1e-16))                      # (TN, 1)
    inv12 = jax.lax.rsqrt(jnp.maximum(sumsq, 1e-24))                     # (TN, 1)

    # --- cosine embedding loss, y = +1, margin = 0 ---
    # cos_sim(x, one_hot) = x_t / max(||x||, 1e-8); ||one_hot|| == 1.
    cos_loss = 1.0 - x_t * inv8                                          # (TN, 1)

    # --- cross entropy on F.normalize(x) (dim=1) without materializing xn ---
    # xn = x * inv12 (inv12 > 0), so max(xn) = max(x) * inv12 and
    # exp(xn - max(xn)) = exp((x - max(x)) * inv12); xn[t] = x_t * inv12.
    x_max = jnp.max(x, axis=-1, keepdims=True)                           # (TN, 1)
    p = jnp.exp((x - x_max) * inv12)                                     # (TN, C)
    lse = x_max * inv12 + jnp.log(jnp.sum(p, axis=-1, keepdims=True))    # (TN, 1)
    ce = lse - x_t * inv12                                               # (TN, 1)

    # Mask padded rows of the ragged last tile (select, so NaN/garbage padding
    # never reaches the sums). Only emitted when the tail is actually ragged.
    if n_rows % tn != 0:
        row = i * tn + jax.lax.broadcasted_iota(jnp.int32, (tn, 1), 0)
        valid = row < n_rows
        cos_loss = jnp.where(valid, cos_loss, 0.0)
        ce = jnp.where(valid, ce, 0.0)

    cos_sum = jnp.sum(cos_loss)
    ce_sum = jnp.sum(ce)

    # Lane-dense (1, 8, 128) partial-sum block: [0,0,0]=cosine, [0,0,1]=CE.
    sub = jax.lax.broadcasted_iota(jnp.int32, (1, 8, 128), 1)
    lane = jax.lax.broadcasted_iota(jnp.int32, (1, 8, 128), 2)
    out_ref[...] = jnp.where((sub == 0) & (lane == 0), cos_sum,
                             jnp.where((sub == 0) & (lane == 1), ce_sum, 0.0))


def _round_up(v, m):
    return ((v + m - 1) // m) * m


def focal_cosine_loss(x, target, *, alpha=1.0, gamma=2.0, xent=0.1,
                      block_rows=None):
    """Matches FocalCosineLoss(alpha, gamma, xent, reduction='mean').forward(x, target)."""
    n, c = x.shape
    t2d = target.astype(jnp.int32).reshape(n, 1)

    itemsize = jnp.dtype(x.dtype).itemsize
    if itemsize == 1:
        align = 32
    elif itemsize == 2:
        align = 16
    else:
        align = 8

    c_pad = _round_up(c, 128)

    # Honest per-row VMEM footprint: double-buffered x tile (lane-padded),
    # double-buffered int32 target column (lane dim 1 padded to 128), the f32
    # (tn, C) temporaries Mosaic may materialize (upcast copy / shifted-scaled
    # logits / exp), and a handful of (tn, 1) f32 row vectors (lane-padded).
    f32_row_tmps = 3 if itemsize < 4 else 2
    per_row_bytes = (2 * c_pad * itemsize          # x double buffer
                     + 2 * 128 * 4                 # target double buffer
                     + f32_row_tmps * c_pad * 4    # (tn, C) f32 temporaries
                     + 8 * 128 * 4)                # (tn, 1) f32 row temporaries

    vmem_budget = 20 * 1024 * 1024                 # working-set target, all gens
    tn = max(align, (vmem_budget // per_row_bytes) // align * align)
    if block_rows is not None:
        tn = min(tn, max(align, (block_rows // align) * align))
    tn = min(tn, _round_up(n, align))
    num_tiles = pl.cdiv(n, tn)

    vmem_est = tn * per_row_bytes + 2 * 8 * 128 * 4    # + output double buffer
    vmem_limit = min(32 * 1024 * 1024,
                     max(4 * 1024 * 1024, int(vmem_est * 3) // 2))

    kernel = functools.partial(_focal_cosine_kernel, n_rows=n)

    partials = pl.pallas_call(
        kernel,
        out_shape=jax.ShapeDtypeStruct((num_tiles, 8, 128), jnp.float32),
        grid_spec=pltpu.PrefetchScalarGridSpec(
            num_scalar_prefetch=0,
            grid=(num_tiles,),
            in_specs=[
                pl.BlockSpec((tn, c), lambda i: (i, 0)),
                pl.BlockSpec((tn, 1), lambda i: (i, 0)),
            ],
            out_specs=pl.BlockSpec((1, 8, 128), lambda i: (i, 0, 0)),
        ),
        compiler_params=pltpu.CompilerParams(
            dimension_semantics=("parallel",),
            vmem_limit_bytes=vmem_limit,
        ),
        cost_estimate=pl.CostEstimate(
            flops=int(10 * n * c),
            transcendentals=int(n * c + 2 * n),
            bytes_accessed=int(n * c * itemsize + n * 4
                               + num_tiles * 8 * 128 * 4),
        ),
    )(x, t2d)

    # Per-tile partials -> scalars (pairwise-style tree sum over tiles).
    sums = jnp.sum(partials, axis=0)                 # (8, 128)
    cosine_loss = sums[0, 0] / n                     # reduction == 'mean'
    cent_loss = sums[0, 1] / n

    # Focal term applied to the *reduced* CE (exactly as in the PyTorch module).
    pt = jnp.exp(-cent_loss)
    focal_loss = alpha * (1.0 - pt) ** gamma * cent_loss
    return cosine_loss + xent * focal_loss


def _reference(x, target, alpha=1.0, gamma=2.0, xent=0.1):
    # Pure-JAX reference mirroring torch semantics (for verification only).
    n, c = x.shape
    onehot = jax.nn.one_hot(target, c, dtype=jnp.float32)
    norm = jnp.sqrt(jnp.sum(x * x, axis=-1))
    cos = jnp.sum(x * onehot, axis=-1) / jnp.maximum(norm, 1e-8)
    cosine_loss = jnp.mean(1.0 - cos)
    xn = x / jnp.maximum(norm, 1e-12)[:, None]
    logp = jax.nn.log_softmax(xn, axis=-1)
    cent = jnp.mean(-jnp.sum(logp * onehot, axis=-1))
    pt = jnp.exp(-cent)
    focal = alpha * (1.0 - pt) ** gamma * cent
    return cosine_loss + xent * focal


if __name__ == "__main__":
    key = jax.random.PRNGKey(0)
    kx, kt = jax.random.split(key)

    # Case 1: single tile (N=8, C=32).
    N, C = 8, 32
    x = jax.random.normal(kx, (N, C), dtype=jnp.float32)
    target = jax.random.randint(kt, (N,), 0, C, dtype=jnp.int32)
    out = jax.block_until_ready(focal_cosine_loss(x, target))
    ref = _reference(x, target)
    assert jnp.allclose(out, ref, rtol=1e-5, atol=1e-5), (out, ref)

    # Case 2: multi-tile "parallel" grid with a ragged tail (exercises the
    # per-tile partial outputs + select-based row masking).
    kx2, kt2 = jax.random.split(jax.random.PRNGKey(0))
    N2, C2 = 20, 64
    x2 = jax.random.normal(kx2, (N2, C2), dtype=jnp.float32)
    t2 = jax.random.randint(kt2, (N2,), 0, C2, dtype=jnp.int32)
    out2 = jax.block_until_ready(focal_cosine_loss(x2, t2, block_rows=8))
    ref2 = _reference(x2, t2)
    assert jnp.allclose(out2, ref2, rtol=1e-5, atol=1e-5), (out2, ref2)

    print("KERNEL_OK")
</pallas_src>

<mosaic_0001>
module attributes {stable_mosaic.version = 11 : i64} {
  func.func @_focal_cosine_kernel(%arg0: i32, %arg1: memref<8x32xf32, #tpu.memory_space<vmem>>, %arg2: memref<8x1xi32, #tpu.memory_space<vmem>>, %arg3: memref<1x8x128xf32, #tpu.memory_space<vmem>>) attributes {dimension_semantics = [#tpu.dimension_semantics<parallel>], iteration_bounds = array<i64: 1>, scalar_prefetch = 0 : i64, scratch_operands = 0 : i64, tpu.core_type = #tpu.core_type<tc>, window_params = [{transform_indices = @transform_0, window_bounds = array<i64: 8, 32>}, {transform_indices = @transform_1, window_bounds = array<i64: 8, 1>}, {transform_indices = @transform_2, window_bounds = array<i64: 1, 8, 128>}]} {
    %c0 = arith.constant 0 : index
    %c0_0 = arith.constant 0 : index
    %0 = vector.load %arg1[%c0, %c0_0] : memref<8x32xf32, #tpu.memory_space<vmem>>, vector<8x32xf32>
    %c0_1 = arith.constant 0 : index
    %c0_2 = arith.constant 0 : index
    %1 = vector.load %arg2[%c0_1, %c0_2] : memref<8x1xi32, #tpu.memory_space<vmem>>, vector<8x1xi32>
    %2 = tpu.iota {dimensions = array<i32: 1>} : vector<8x32xi32>
    %3 = vector.broadcast %1 : vector<8x1xi32> to vector<8x32xi32>
    %4 = arith.cmpi eq, %2, %3 : vector<8x32xi32>
    %cst = arith.constant 0.000000e+00 : f32
    %5 = vector.broadcast %cst : f32 to vector<8x32xf32>
    %6 = arith.select %4, %0, %5 : vector<8x32xi1>, vector<8x32xf32>
    %cst_3 = arith.constant dense<0.000000e+00> : vector<8xf32>
    %7 = vector.multi_reduction <add>, %6, %cst_3 [1] : vector<8x32xf32> to vector<8xf32>
    %8 = vector.shape_cast %7 : vector<8xf32> to vector<8x1xf32>
    %9 = arith.mulf %0, %0 : vector<8x32xf32>
    %cst_4 = arith.constant dense<0.000000e+00> : vector<8xf32>
    %10 = vector.multi_reduction <add>, %9, %cst_4 [1] : vector<8x32xf32> to vector<8xf32>
    %11 = vector.shape_cast %10 : vector<8xf32> to vector<8x1xf32>
    %cst_5 = arith.constant 1.000000e-16 : f32
    %12 = vector.broadcast %cst_5 : f32 to vector<8x1xf32>
    %13 = arith.maximumf %11, %12 : vector<8x1xf32>
    %14 = math.rsqrt %13 : vector<8x1xf32>
    %cst_6 = arith.constant 1.000000e-24 : f32
    %15 = vector.broadcast %cst_6 : f32 to vector<8x1xf32>
    %16 = arith.maximumf %11, %15 : vector<8x1xf32>
    %17 = math.rsqrt %16 : vector<8x1xf32>
    %18 = arith.mulf %8, %14 : vector<8x1xf32>
    %cst_7 = arith.constant 1.000000e+00 : f32
    %19 = vector.broadcast %cst_7 : f32 to vector<8x1xf32>
    %20 = arith.subf %19, %18 : vector<8x1xf32>
    %cst_8 = arith.constant dense<0xFF800000> : vector<8xf32>
    %21 = vector.multi_reduction <maximumf>, %0, %cst_8 [1] : vector<8x32xf32> to vector<8xf32>
    %22 = vector.shape_cast %21 : vector<8xf32> to vector<8x1xf32>
    %23 = vector.broadcast %22 : vector<8x1xf32> to vector<8x32xf32>
    %24 = arith.subf %0, %23 : vector<8x32xf32>
    %25 = vector.broadcast %17 : vector<8x1xf32> to vector<8x32xf32>
    %26 = arith.mulf %24, %25 : vector<8x32xf32>
    %27 = math.exp %26 : vector<8x32xf32>
    %28 = arith.mulf %22, %17 : vector<8x1xf32>
    %cst_9 = arith.constant dense<0.000000e+00> : vector<8xf32>
    %29 = vector.multi_reduction <add>, %27, %cst_9 [1] : vector<8x32xf32> to vector<8xf32>
    %30 = vector.shape_cast %29 : vector<8xf32> to vector<8x1xf32>
    %31 = math.log %30 : vector<8x1xf32>
    %32 = arith.addf %28, %31 : vector<8x1xf32>
    %33 = arith.mulf %8, %17 : vector<8x1xf32>
    %34 = arith.subf %32, %33 : vector<8x1xf32>
    %35 = vector.shape_cast %20 : vector<8x1xf32> to vector<1x8x1xf32>
    %cst_10 = arith.constant dense<0.000000e+00> : vector<1xf32>
    %36 = vector.multi_reduction <add>, %35, %cst_10 [1, 2] : vector<1x8x1xf32> to vector<1xf32>
    %37 = vector.shape_cast %36 : vector<1xf32> to vector<1x1x1xf32>
    %38 = vector.extract %37[0, 0, 0] : f32 from vector<1x1x1xf32>
    %39 = vector.shape_cast %34 : vector<8x1xf32> to vector<1x8x1xf32>
    %cst_11 = arith.constant dense<0.000000e+00> : vector<1xf32>
    %40 = vector.multi_reduction <add>, %39, %cst_11 [1, 2] : vector<1x8x1xf32> to vector<1xf32>
    %41 = vector.shape_cast %40 : vector<1xf32> to vector<1x1x1xf32>
    %42 = vector.extract %41[0, 0, 0] : f32 from vector<1x1x1xf32>
    %43 = tpu.iota {dimensions = array<i32: 1>} : vector<1x8x128xi32>
    %44 = tpu.iota {dimensions = array<i32: 2>} : vector<1x8x128xi32>
    %c0_i32 = arith.constant 0 : i32
    %45 = vector.broadcast %c0_i32 : i32 to vector<1x8x128xi32>
    %46 = arith.cmpi eq, %43, %45 : vector<1x8x128xi32>
    %c0_i32_12 = arith.constant 0 : i32
    %47 = vector.broadcast %c0_i32_12 : i32 to vector<1x8x128xi32>
    %48 = arith.cmpi eq, %44, %47 : vector<1x8x128xi32>
    %49 = arith.andi %46, %48 : vector<1x8x128xi1>
    %c0_i32_13 = arith.constant 0 : i32
    %50 = vector.broadcast %c0_i32_13 : i32 to vector<1x8x128xi32>
    %51 = arith.cmpi eq, %43, %50 : vector<1x8x128xi32>
    %c1_i32 = arith.constant 1 : i32
    %52 = vector.broadcast %c1_i32 : i32 to vector<1x8x128xi32>
    %53 = arith.cmpi eq, %44, %52 : vector<1x8x128xi32>
    %54 = arith.andi %51, %53 : vector<1x8x128xi1>
    %cst_14 = arith.constant 0.000000e+00 : f32
    %55 = vector.broadcast %42 : f32 to vector<1x8x128xf32>
    %56 = vector.broadcast %cst_14 : f32 to vector<1x8x128xf32>
    %57 = arith.select %54, %55, %56 : vector<1x8x128xi1>, vector<1x8x128xf32>
    %58 = vector.broadcast %38 : f32 to vector<1x8x128xf32>
    %59 = arith.select %49, %58, %57 : vector<1x8x128xi1>, vector<1x8x128xf32>
    %c0_15 = arith.constant 0 : index
    %c0_16 = arith.constant 0 : index
    %c0_17 = arith.constant 0 : index
    %60 = vector.load %arg3[%c0_15, %c0_16, %c0_17] : memref<1x8x128xf32, #tpu.memory_space<vmem>>, vector<1x8x128xf32>
    tpu.vector_store %arg3[%c0_15, %c0_16, %c0_17], %59 {strides = array<i32>} : memref<1x8x128xf32, #tpu.memory_space<vmem>>, vector<1x8x128xf32>,
    return
  }
  func.func @transform_0(%arg0: i32) -> (i32, i32) {
    %c0_i32 = arith.constant 0 : i32
    %c0_i32_0 = arith.constant 0 : i32
    return %arg0, %c0_i32 : i32, i32
  }
  func.func @transform_1(%arg0: i32) -> (i32, i32) {
    %c0_i32 = arith.constant 0 : i32
    %c0_i32_0 = arith.constant 0 : i32
    return %arg0, %c0_i32 : i32, i32
  }
  func.func @transform_2(%arg0: i32) -> (i32, i32, i32) {
    %c0_i32 = arith.constant 0 : i32
    %c0_i32_0 = arith.constant 0 : i32
    %c0_i32_1 = arith.constant 0 : i32
    return %arg0, %c0_i32, %c0_i32_0 : i32, i32, i32
  }
}

</mosaic_0001>

<bundles_post_ra>
// kernel: tpu_custom_call.1
= control target key start
LH: loop header
LB: loop body
LE: loop exit
PB: predicated region body
PF: predicated region fallthrough
CT: control target
= control target key end

     0   :  { %vm21_vm0 = vcmask 261120   ;;  %s177_s0 = inlined_call_operand.vmem [shape: f32[8,32], index: 0, kind: input, shape index: {}]   ;;  %s178_s1 = inlined_call_operand.vmem [shape: s32[8,1], index: 1, kind: input, shape index: {}]   ;;  %s179_s2 = inlined_call_operand.hbm [shape: f32[1,8,128], index: 2, kind: output, shape index: {}]  }
   0x1   :  { %v13_v0 = vld [vmem:[%s178_s1] sm:$0xff] }
   0x2   :  { %v12_v1 = vld [vmem:[%s177_s0] sm:$0xff] }
   0x3   :  { %7 = vsyncpa [#allocation3], 0  ;;  %v138_v2 = vmov 0   ;;  %v25_v3 = vmul.f32 %v12_v1, %v12_v1  ;;  %v35_v5 = vsel %vm21_vm0, %v12_v1, -inf  ;;  %v14_v6 = vlaneseq  ;;  %s139_s1 = smov [#allocation2]  }
   0x4   :  { %104 = vset.pattern.permute.xlu1 %v138_v2  ;;  %105 = vset.pattern.permute.xlu0 %v138_v2  ;;  %vm51_vm2 = vcmask 7168   ;;  %s90_s13 = sshll.u32 %s139_s1, 4  ;;  %s91_s13 = int_to_ptr.vmem [resolvable:$true] %s90_s13 }
   0x5   :  { %17 = vperm.xlu1 %104, %v13_v0   ;;  %v26_v4 = vsel %vm21_vm0, %v25_v3, 0.0  ;;  %v15_v7 = vand.u32 127, %v14_v6  ;;  %v73_v48 = vshrl.u32 %v14_v6, 7  ;;  %s114_s15 = scalar_lea.vmem %s91_s13, 128  ;;  %p119_p1 = scmp.lt.s32.totalorder %s91_s13, %s91_s13 }
   0x6   :  { %27 = vadd.xlane.f32.xlu0 %v26_v4  ;;  %p115_p0 = scmp.ne.s32.totalorder %s91_s13, %s114_s15  ;;  %p120_p2 = scmp.lt.s32.totalorder %s114_s15, %s114_s15 }
   0x7   :  { %vm74_vm3 = vcmp.eq.s32.totalorder %v73_v48, 0  ;;  %vm77_vm4 = vcmp.eq.s32.totalorder %v15_v7, 1  ;;  %vm75_vm5 = vcmp.eq.s32.totalorder %v15_v7, 0 }
   0x8   :  { %vm78_vm6 = vmand %vm74_vm3, %vm77_vm4  ;;  %p121_p3 = por %p120_p2, %p119_p1 }
   0x9   :  { %vm76_vm7 = vmand %vm74_vm3, %vm75_vm5 }
   0xa   :  { %36 = vmax.xlane.f32.xlu0 %v35_v5  ;;  %p122_p4 = pnand %p121_p3, %p115_p0 }
  0x84   :  { %v18_v8 = vpop.permute.xlu1 %17 }
  0x85   :  { %vm19_vm1 = vcmp.eq.s32.totalorder %v15_v7, %v18_v8 }
  0x86   :  { %v20_v9 = vsel %vm19_vm1, %v12_v1, 0.0 }
  0x87   :  { %v22_v10 = vsel %vm21_vm0, %v20_v9, 0.0 }
  0x88   :  { %23 = vadd.xlane.f32.xlu0 %v22_v10 }
  0x93   :  { %v28_v11 = vpop.xlane.xlu0 %27 }
  0x94   :  { %v31_v12 = vmax.f32 %v28_v11, 1e-24  ;;  %v29_v20 = vmax.f32 %v28_v11, 1e-16 }
  0x96   :  { %106 = vrsqrt.f32 %v31_v12 }
  0x97   :  { %v37_v13 = vpop.xlane.xlu0 %36 }
  0x98   :  { %v38_v14 = vsub.f32 %v12_v1, %v37_v13 }
  0xa0   :  { %v107_v15 = vpop.eup %106 }
  0xa1   :  { %v39_v16 = vmul.f32 %v107_v15, %v38_v14  ;;  %v42_v28 = vmul.f32 %v107_v15, %v37_v13 }
  0xa3   :  { %v40_v17 = vmul.f32 1.442695, %v39_v16 }
  0xa5   :  { %108 = vpow2.f32 %v40_v17 }
  0xa6   :  { %110 = vrsqrt.f32 %v29_v20 }
  0xaf   :  { %v109_v18 = vpop.eup %108 }
  0xb0   :  { %v43_v19 = vsel %vm21_vm0, %v109_v18, 0.0  ;;  %v111_v21 = vpop.eup %110 }
  0xb1   :  { %44 = vadd.xlane.f32.xlu1 %v43_v19 }
 0x115   :  { %v24_v22 = vpop.xlane.xlu0 %23 }
 0x116   :  { %v33_v23 = vmul.f32 %v111_v21, %v24_v22  ;;  %v49_v30 = vmul.f32 %v107_v15, %v24_v22 }
 0x118   :  { %v34_v24 = vsub.f32 1.0, %v33_v23 }
 0x11a   :  { %v52_v25 = vsel %vm51_vm2, %v34_v24, 0.0 }
 0x11b   :  { %53 = vadd.xlane.f32.xlu0 %v52_v25 }
 0x13e   :  { %v45_v26 = vpop.xlane.xlu1 %44 }
 0x13f   :  { %112 = vlog2.f32 %v45_v26 }
 0x149   :  { %v113_v27 = vpop.eup %112 }
 0x14a   :  { %v47_v29 = vmul.f32 0.6931472, %v113_v27 }
 0x14c   :  { %v48_v31 = vadd.f32 %v47_v29, %v42_v28 }
 0x14e   :  { %v50_v32 = vsub.f32 %v48_v31, %v49_v30 }
 0x150   :  { %v62_v33 = vsel %vm51_vm2, %v50_v32, 0.0 }
 0x151   :  { %63 = vadd.xlane.f32.xlu0 %v62_v33 }
 0x1a8   :  { %v54_v34 = vpop.xlane.xlu0 %53 }
 0x1a9   :  { %v55_v35 = vrot.slane %v54_v34, 4 }
 0x1ab   :  { %v56_v36 = vadd.f32 %v55_v35, %v54_v34 }
 0x1ad   :  { %v57_v37 = vrot.slane %v56_v36, 2 }
 0x1af   :  { %v58_v38 = vadd.f32 %v57_v37, %v56_v36 }
 0x1b1   :  { %v59_v39 = vrot.slane %v58_v38, 1 }
 0x1b3   :  { %v60_v40 = vadd.f32 %v59_v39, %v58_v38 }
 0x1b5   :  { %98 = vpush %v60_v40 }
 0x1de   :  { %v64_v41 = vpop.xlane.xlu0 %63 }
 0x1df   :  { %v65_v42 = vrot.slane %v64_v41, 4 }
 0x1e1   :  { %v66_v43 = vadd.f32 %v65_v42, %v64_v41 }
 0x1e3   :  { %v67_v44 = vrot.slane %v66_v43, 2 }
 0x1e5   :  { %v68_v45 = vadd.f32 %v67_v44, %v66_v43 }
 0x1e6   :  { %s99_s0 = spop %98 }
 0x1e7   :  { %v69_v46 = vrot.slane %v68_v45, 1  ;;  %v81_v50 = vstv %s99_s0 }
 0x1e9   :  { %v70_v47 = vadd.f32 %v69_v46, %v68_v45 }
 0x1eb   :  { %100 = vpush %v70_v47 }
 0x21c   :  { %s101_s14 = spop %100 }
 0x21d   :  { %v79_v49 = vstv %s101_s14 }
 0x21e   :  { %v80_v51 = vsel %vm78_vm6, %v79_v49, 0.0 }
 0x21f   :  { %v82_v52 = vsel %vm76_vm7, %v81_v50, %v80_v51 }
 0x220   :  { %83 = vst [vmem:[#allocation2] sm:$0xff] %v82_v52 }
 0x221   :  { %125 = shalt.err (!%p122_p4)
}
 0x222   :  { %s126_s18 = scalar_lea.hbm %s179_s2, 128 }
 0x223   :  { %p127_p5 = scmp.ne.s32.totalorder %s179_s2, %s126_s18  ;;  %p130_p6 = scmp.lt.u32.totalorder %s126_s18, %s179_s2 }
 0x225   :  { %p132_p7 = pnand %p130_p6, %p127_p5 }
 0x227   :  { %135 = shalt.err (!%p132_p7)
}
 0x228   :  { %93 = dma.vmem_to_hbm [thread:$0]  %s91_s13, 128, %s179_s2, [#allocation3]  }
 0x229   :  { %136 = dma.done.wait [#allocation3], 128  }
 0x22a   :  { %137 = vsyncadd [#allocation3], 4294967168 }
 0x22b   :  { %97 = vsyncpa [#allocation3], 1 }

</bundles_post_ra>
